<compile_context>
chip_gen: v5e
topology: v5e:2x2
jax: 0.10.0
libtpu: 0.0.40
codegen_flags: <defaults>
</compile_context>

<pallas_src>
import functools
import math

import jax
import jax.numpy as jnp
import numpy as np
from jax.experimental import pallas as pl
from jax.experimental.pallas import tpu as pltpu


def _round_up(x, n):
    return ((x + n - 1) // n) * n


def _tpu_generation():
    """Coarse chip-generation detection (trace-time, Python only)."""
    try:
        kind = jax.devices()[0].device_kind.lower()
    except Exception:
        kind = ""
    if "v7" in kind:
        return "v7"
    if "v6" in kind:
        return "v6"
    if "v5" in kind:
        return "v5"
    return "other"


def _choose_tile_hw(hw_pad, bytes_per_col, lane_cap, tile_budget_bytes):
    """Pick the lane-dim tile (pixels per grid step along H*W).

    Largest multiple of 128 whose per-tile working set fits the VMEM budget,
    capped at lane_cap (2048 on v7x, 4096 elsewhere), and kept small enough that
    there are >=2 HW tiles whenever HW > 128 so each TensorCore's share of the
    (B, tiles) grid pipelines DMA with compute.
    """
    vmem_cap = max(128, (tile_budget_bytes // max(1, bytes_per_col)) // 128 * 128)
    cap = min(lane_cap, vmem_cap)
    if hw_pad <= 128:
        return 128
    two_step = _round_up((hw_pad + 1) // 2, 128)  # guarantees >=2 tiles along HW
    return max(128, min(cap, two_step))


def _make_stack_kernel(num_layers, chid, gate_dtype):
    """Fused fresh-state ConvLSTM stack kernel.

    Refs (in order): x (cin0, TM) bf16, then per layer
    [w_in, w_out, w_cell (chid, cin_l) bf16, b_in, b_out, b_cell (chid, 1) f32],
    then h_out (chid, TM).  The remember gate only multiplies the (zero) previous
    cell state, so its weights are dropped entirely.
    """

    def kernel(x_ref, *refs):
        h_out_ref = refs[-1]
        wb = refs[:-1]
        assert len(wb) == 6 * num_layers  # trace-time check

        inp = x_ref[...]                                      # (cin_l, TM) bf16
        hidden = None
        for layer in range(num_layers):
            w_i, w_o, w_g, b_i, b_o, b_g = wb[6 * layer:6 * layer + 6]
            # 1x1 conv == per-pixel channel matmul. bf16 MXU, f32 accumulation,
            # f32 bias add, then gate math at gate_dtype (bf16 on v6e/v7x, f32 on v5e).
            g_i = (jnp.dot(w_i[...], inp, preferred_element_type=jnp.float32)
                   + b_i[...]).astype(gate_dtype)
            g_o = (jnp.dot(w_o[...], inp, preferred_element_type=jnp.float32)
                   + b_o[...]).astype(gate_dtype)
            g_g = (jnp.dot(w_g[...], inp, preferred_element_type=jnp.float32)
                   + b_g[...]).astype(gate_dtype)
            # sigmoid(x) == 0.5*tanh(0.5*x) + 0.5  (single EUP push per gate).
            in_gate = 0.5 * jnp.tanh(0.5 * g_i) + 0.5
            out_gate = 0.5 * jnp.tanh(0.5 * g_o) + 0.5
            cell_gate = jnp.tanh(g_g)
            cell = in_gate * cell_gate                        # f * c_prev == 0 (fresh state)
            hidden = out_gate * jnp.tanh(cell)
            inp = hidden.astype(jnp.bfloat16)                 # feed next layer (stays in VMEM)
        h_out_ref[...] = hidden.astype(h_out_ref.dtype)

    return kernel


def convlstm_stack(x3d, layer_params, out_dtype=jnp.bfloat16):
    """x3d: (B, Cin0, HW) -- pixels of one image on the lane dim, per batch element.
    layer_params: per layer (w_in, w_out, w_cell (chid, cin_l) bf16,
                             b_in, b_out, b_cell (chid, 1) f32).
    Returns last layer's hidden state, shape (B, chid, HW), dtype out_dtype."""
    b, cin0, hw = x3d.shape
    chid = layer_params[0][0].shape[0]
    num_layers = len(layer_params)

    gen = _tpu_generation()
    # bf16 gate math only where VALU/EUP are bf16-capable; f32 elsewhere (v5e etc.).
    gate_dtype = jnp.bfloat16 if gen in ("v6", "v7") else jnp.float32
    lane_cap = 2048 if gen == "v7" else 4096
    phys_vmem = (64 << 20) if gen == "v7" else (128 << 20)

    flat_wb = []
    for p in layer_params:
        flat_wb += list(p)
    w_bytes = sum(int(np.prod(a.shape)) * a.dtype.itemsize for a in flat_wb)

    gate_it = jnp.dtype(gate_dtype).itemsize
    out_it = jnp.dtype(out_dtype).itemsize
    # Per lane-column working set: double-buffered x tile (bf16) + double-buffered
    # out tile + ~9 live (chid, TM) intermediates per unrolled layer at gate precision.
    bytes_per_col = (2 * cin0 * 2) + (2 * chid * out_it) + num_layers * 9 * chid * gate_it
    tile_budget = max(4 << 20, phys_vmem // 2 - 2 * w_bytes)

    hw_pad = _round_up(hw, 128)
    tile_hw = _choose_tile_hw(hw_pad, bytes_per_col, lane_cap, tile_budget)
    hw_pad = _round_up(hw_pad, tile_hw)
    if hw_pad != hw:
        x3d = jnp.pad(x3d, ((0, 0), (0, 0), (0, hw_pad - hw)))
    x3d = x3d.astype(jnp.bfloat16)

    grid = (b, hw_pad // tile_hw)

    in_specs = [pl.BlockSpec((None, cin0, tile_hw), lambda bi, ti: (bi, 0, ti))]
    for a in flat_wb:
        in_specs.append(pl.BlockSpec(a.shape, lambda bi, ti: (0, 0)))  # resident weight/bias
    out_spec = pl.BlockSpec((None, chid, tile_hw), lambda bi, ti: (bi, 0, ti))  # lane-dense

    est_bytes = tile_hw * bytes_per_col + 2 * w_bytes
    vmem_cap = (48 << 20) if gen == "v7" else (96 << 20)
    vmem_limit = int(min(vmem_cap, max(32 << 20, 2 * est_bytes)))

    out = pl.pallas_call(
        _make_stack_kernel(num_layers, chid, gate_dtype),
        out_shape=jax.ShapeDtypeStruct((b, chid, hw_pad), out_dtype),
        grid_spec=pltpu.PrefetchScalarGridSpec(
            num_scalar_prefetch=0,
            grid=grid,
            in_specs=in_specs,
            out_specs=out_spec,
        ),
        compiler_params=pltpu.CompilerParams(
            dimension_semantics=("parallel", "parallel"),
            vmem_limit_bytes=vmem_limit,
        ),
    )(x3d, *flat_wb)
    return out[:, :, :hw]


def convlstm_forward(x_nchw, kernel_params, out_dtype=jnp.bfloat16):
    """Full ConvLSTM stack forward. x_nchw: (B, C, H, W) f32 -> (B, hidden, H, W).

    NCHW -> (B, C, H*W) is a pure reshape (no transpose), and the kernel writes
    (B, hidden, H*W) directly, so there is no pre/post transpose through HBM."""
    b, c, h, w = x_nchw.shape
    chid = kernel_params[0][0].shape[0]
    x3d = x_nchw.reshape(b, c, h * w)
    h3d = convlstm_stack(x3d, kernel_params, out_dtype=out_dtype)   # (B, chid, HW)
    return h3d.reshape(b, chid, h, w)


def init_convlstm_params(key, input_channels, hidden_channels, hidden_layer_num):
    """Full Conv2d-style params mimicking nn.Conv2d default init for each cell.

    Per layer: weight (4*hidden, cin_l + hidden) (1x1 kernel squeezed), bias (4*hidden,).
    """
    params = []
    for i in range(hidden_layer_num):
        cin = input_channels if i == 0 else hidden_channels
        fan_in = cin + hidden_channels  # * 1 * 1 (kernel_size=1)
        bound = 1.0 / math.sqrt(fan_in)
        key, kw, kb = jax.random.split(key, 3)
        w_full = jax.random.uniform(
            kw, (4 * hidden_channels, fan_in), jnp.float32, -bound, bound)
        b_full = jax.random.uniform(
            kb, (4 * hidden_channels,), jnp.float32, -bound, bound)
        params.append((w_full, b_full))
    return params


def pack_kernel_params(params, input_channels, hidden_channels):
    """Strip dead weights and pack per-gate for the fused kernel.

    Fresh forward: prev hidden is zero, so the Wh columns are dead; prev cell is
    zero, so the remember-gate rows are dead.  Keep only the Wx columns of the
    in/out/cell gates, split per gate, stored bf16 (biases stay f32, (chid, 1))."""
    hid = hidden_channels
    packed = []
    for i, (w_full, b_full) in enumerate(params):
        cin = input_channels if i == 0 else hid
        wx = w_full[:, :cin]                                   # columns acting on layer input
        w_i = wx[0 * hid:1 * hid].astype(jnp.bfloat16)
        w_o = wx[2 * hid:3 * hid].astype(jnp.bfloat16)
        w_g = wx[3 * hid:4 * hid].astype(jnp.bfloat16)
        b_i = b_full[0 * hid:1 * hid].reshape(hid, 1).astype(jnp.float32)
        b_o = b_full[2 * hid:3 * hid].reshape(hid, 1).astype(jnp.float32)
        b_g = b_full[3 * hid:4 * hid].reshape(hid, 1).astype(jnp.float32)
        packed.append((w_i, w_o, w_g, b_i, b_o, b_g))
    return packed


def _reference_forward(x_nchw, params, hidden_channels):
    """Pure-JAX f32 mirror of the PyTorch module (fresh forward, zero prev states)."""
    b, c, h, w = x_nchw.shape
    m = b * h * w
    hid = hidden_channels
    nxt = jnp.transpose(x_nchw, (0, 2, 3, 1)).reshape(m, c)
    hidden = None
    for (w_full, b_full) in params:
        h_prev = jnp.zeros((m, hid), jnp.float32)
        c_prev = jnp.zeros((m, hid), jnp.float32)
        stacked = jnp.concatenate([nxt, h_prev], axis=1)       # cat([x, h_prev], ch)
        gates = stacked @ w_full.T + b_full
        i = jax.nn.sigmoid(gates[:, 0 * hid:1 * hid])
        f = jax.nn.sigmoid(gates[:, 1 * hid:2 * hid])
        o = jax.nn.sigmoid(gates[:, 2 * hid:3 * hid])
        g = jnp.tanh(gates[:, 3 * hid:4 * hid])
        cell = f * c_prev + i * g
        hidden = o * jnp.tanh(cell)
        nxt = hidden
    return jnp.transpose(hidden.reshape(b, h, w, hid), (0, 3, 1, 2))


if __name__ == "__main__":
    # Small shapes consistent with a ConvLSTM forward (the Pallas path consumes one
    # 4-D NCHW frame, matching what each ConvLSTMCell's Conv2d sees).
    B, C_IN, H, W = 2, 4, 16, 16
    HIDDEN = 32
    LAYERS = 2

    key = jax.random.PRNGKey(0)
    key, kx = jax.random.split(key)
    x = jax.random.normal(kx, (B, C_IN, H, W), jnp.float32)

    params = init_convlstm_params(key, C_IN, HIDDEN, LAYERS)
    kparams = pack_kernel_params(params, C_IN, HIDDEN)

    fwd = jax.jit(functools.partial(convlstm_forward, out_dtype=jnp.bfloat16))
    out = jax.block_until_ready(fwd(x, kparams))
    ref = jax.block_until_ready(_reference_forward(x, params, HIDDEN))

    assert out.shape == (B, HIDDEN, H, W)
    # bf16 weights/activations, bf16 gate math (v6e/v7x) and bf16 output storage vs
    # an all-f32 reference => loosened (but still meaningful for O(0.1..1) outputs)
    # tolerance.
    np.testing.assert_allclose(np.asarray(out).astype(np.float32), np.asarray(ref),
                               rtol=2e-2, atol=2e-2)

    print("KERNEL_OK")
</pallas_src>

<mosaic_0001>
module attributes {stable_mosaic.version = 11 : i64} {
  func.func @kernel(%arg0: i32, %arg1: i32, %arg2: memref<1x4x128xbf16, #tpu.memory_space<vmem>>, %arg3: memref<32x4xbf16, #tpu.memory_space<vmem>>, %arg4: memref<32x4xbf16, #tpu.memory_space<vmem>>, %arg5: memref<32x4xbf16, #tpu.memory_space<vmem>>, %arg6: memref<32x1xf32, #tpu.memory_space<vmem>>, %arg7: memref<32x1xf32, #tpu.memory_space<vmem>>, %arg8: memref<32x1xf32, #tpu.memory_space<vmem>>, %arg9: memref<32x32xbf16, #tpu.memory_space<vmem>>, %arg10: memref<32x32xbf16, #tpu.memory_space<vmem>>, %arg11: memref<32x32xbf16, #tpu.memory_space<vmem>>, %arg12: memref<32x1xf32, #tpu.memory_space<vmem>>, %arg13: memref<32x1xf32, #tpu.memory_space<vmem>>, %arg14: memref<32x1xf32, #tpu.memory_space<vmem>>, %arg15: memref<1x32x128xbf16, #tpu.memory_space<vmem>>) attributes {dimension_semantics = [#tpu.dimension_semantics<parallel>, #tpu.dimension_semantics<parallel>], iteration_bounds = array<i64: 2, 2>, scalar_prefetch = 0 : i64, scratch_operands = 0 : i64, tpu.core_type = #tpu.core_type<tc>, window_params = [{transform_indices = @transform_0, window_bounds = array<i64: 1, 4, 128>}, {pipeline_mode = #tpu.pipeline_mode<synchronous>, transform_indices = @transform_1, window_bounds = array<i64: 32, 4>}, {pipeline_mode = #tpu.pipeline_mode<synchronous>, transform_indices = @transform_2, window_bounds = array<i64: 32, 4>}, {pipeline_mode = #tpu.pipeline_mode<synchronous>, transform_indices = @transform_3, window_bounds = array<i64: 32, 4>}, {pipeline_mode = #tpu.pipeline_mode<synchronous>, transform_indices = @transform_4, window_bounds = array<i64: 32, 1>}, {pipeline_mode = #tpu.pipeline_mode<synchronous>, transform_indices = @transform_5, window_bounds = array<i64: 32, 1>}, {pipeline_mode = #tpu.pipeline_mode<synchronous>, transform_indices = @transform_6, window_bounds = array<i64: 32, 1>}, {pipeline_mode = #tpu.pipeline_mode<synchronous>, transform_indices = @transform_7, window_bounds = array<i64: 32, 32>}, {pipeline_mode = #tpu.pipeline_mode<synchronous>, transform_indices = @transform_8, window_bounds = array<i64: 32, 32>}, {pipeline_mode = #tpu.pipeline_mode<synchronous>, transform_indices = @transform_9, window_bounds = array<i64: 32, 32>}, {pipeline_mode = #tpu.pipeline_mode<synchronous>, transform_indices = @transform_10, window_bounds = array<i64: 32, 1>}, {pipeline_mode = #tpu.pipeline_mode<synchronous>, transform_indices = @transform_11, window_bounds = array<i64: 32, 1>}, {pipeline_mode = #tpu.pipeline_mode<synchronous>, transform_indices = @transform_12, window_bounds = array<i64: 32, 1>}, {transform_indices = @transform_13, window_bounds = array<i64: 1, 32, 128>}]} {
    %c0 = arith.constant 0 : index
    %c0_0 = arith.constant 0 : index
    %c0_1 = arith.constant 0 : index
    %0 = vector.load %arg2[%c0, %c0_0, %c0_1] : memref<1x4x128xbf16, #tpu.memory_space<vmem>>, vector<1x4x128xbf16>
    %1 = vector.shape_cast %0 : vector<1x4x128xbf16> to vector<4x128xbf16>
    %c0_2 = arith.constant 0 : index
    %c0_3 = arith.constant 0 : index
    %2 = vector.load %arg3[%c0_2, %c0_3] : memref<32x4xbf16, #tpu.memory_space<vmem>>, vector<32x4xbf16>
    %cst = arith.constant dense<0.000000e+00> : vector<32x128xf32>
    %3 = tpu.matmul %2, %1, %cst {dimension_numbers = #tpu.dot_dimension_numbers<[1], [0], [0], [1], [0, 0, 1, 1], [], []>} : vector<32x4xbf16>, vector<4x128xbf16>, vector<32x128xf32> -> vector<32x128xf32>
    %c0_4 = arith.constant 0 : index
    %c0_5 = arith.constant 0 : index
    %4 = vector.load %arg6[%c0_4, %c0_5] : memref<32x1xf32, #tpu.memory_space<vmem>>, vector<32x1xf32>
    %5 = vector.broadcast %4 : vector<32x1xf32> to vector<32x128xf32>
    %6 = arith.addf %3, %5 : vector<32x128xf32>
    %c0_6 = arith.constant 0 : index
    %c0_7 = arith.constant 0 : index
    %7 = vector.load %arg4[%c0_6, %c0_7] : memref<32x4xbf16, #tpu.memory_space<vmem>>, vector<32x4xbf16>
    %cst_8 = arith.constant dense<0.000000e+00> : vector<32x128xf32>
    %8 = tpu.matmul %7, %1, %cst_8 {dimension_numbers = #tpu.dot_dimension_numbers<[1], [0], [0], [1], [0, 0, 1, 1], [], []>} : vector<32x4xbf16>, vector<4x128xbf16>, vector<32x128xf32> -> vector<32x128xf32>
    %c0_9 = arith.constant 0 : index
    %c0_10 = arith.constant 0 : index
    %9 = vector.load %arg7[%c0_9, %c0_10] : memref<32x1xf32, #tpu.memory_space<vmem>>, vector<32x1xf32>
    %10 = vector.broadcast %9 : vector<32x1xf32> to vector<32x128xf32>
    %11 = arith.addf %8, %10 : vector<32x128xf32>
    %c0_11 = arith.constant 0 : index
    %c0_12 = arith.constant 0 : index
    %12 = vector.load %arg5[%c0_11, %c0_12] : memref<32x4xbf16, #tpu.memory_space<vmem>>, vector<32x4xbf16>
    %cst_13 = arith.constant dense<0.000000e+00> : vector<32x128xf32>
    %13 = tpu.matmul %12, %1, %cst_13 {dimension_numbers = #tpu.dot_dimension_numbers<[1], [0], [0], [1], [0, 0, 1, 1], [], []>} : vector<32x4xbf16>, vector<4x128xbf16>, vector<32x128xf32> -> vector<32x128xf32>
    %c0_14 = arith.constant 0 : index
    %c0_15 = arith.constant 0 : index
    %14 = vector.load %arg8[%c0_14, %c0_15] : memref<32x1xf32, #tpu.memory_space<vmem>>, vector<32x1xf32>
    %15 = vector.broadcast %14 : vector<32x1xf32> to vector<32x128xf32>
    %16 = arith.addf %13, %15 : vector<32x128xf32>
    %cst_16 = arith.constant 5.000000e-01 : f32
    %17 = vector.broadcast %cst_16 : f32 to vector<32x128xf32>
    %18 = arith.mulf %17, %6 : vector<32x128xf32>
    %19 = math.tanh %18 : vector<32x128xf32>
    %cst_17 = arith.constant 5.000000e-01 : f32
    %20 = vector.broadcast %cst_17 : f32 to vector<32x128xf32>
    %21 = arith.mulf %20, %19 : vector<32x128xf32>
    %cst_18 = arith.constant 5.000000e-01 : f32
    %22 = vector.broadcast %cst_18 : f32 to vector<32x128xf32>
    %23 = arith.addf %21, %22 : vector<32x128xf32>
    %cst_19 = arith.constant 5.000000e-01 : f32
    %24 = vector.broadcast %cst_19 : f32 to vector<32x128xf32>
    %25 = arith.mulf %24, %11 : vector<32x128xf32>
    %26 = math.tanh %25 : vector<32x128xf32>
    %cst_20 = arith.constant 5.000000e-01 : f32
    %27 = vector.broadcast %cst_20 : f32 to vector<32x128xf32>
    %28 = arith.mulf %27, %26 : vector<32x128xf32>
    %cst_21 = arith.constant 5.000000e-01 : f32
    %29 = vector.broadcast %cst_21 : f32 to vector<32x128xf32>
    %30 = arith.addf %28, %29 : vector<32x128xf32>
    %31 = math.tanh %16 : vector<32x128xf32>
    %32 = arith.mulf %23, %31 : vector<32x128xf32>
    %33 = math.tanh %32 : vector<32x128xf32>
    %34 = arith.mulf %30, %33 : vector<32x128xf32>
    %35 = arith.truncf %34 : vector<32x128xf32> to vector<32x128xbf16>
    %c0_22 = arith.constant 0 : index
    %c0_23 = arith.constant 0 : index
    %36 = vector.load %arg9[%c0_22, %c0_23] : memref<32x32xbf16, #tpu.memory_space<vmem>>, vector<32x32xbf16>
    %cst_24 = arith.constant dense<0.000000e+00> : vector<32x128xf32>
    %37 = tpu.matmul %36, %35, %cst_24 {dimension_numbers = #tpu.dot_dimension_numbers<[1], [0], [0], [1], [0, 0, 1, 1], [], []>} : vector<32x32xbf16>, vector<32x128xbf16>, vector<32x128xf32> -> vector<32x128xf32>
    %c0_25 = arith.constant 0 : index
    %c0_26 = arith.constant 0 : index
    %38 = vector.load %arg12[%c0_25, %c0_26] : memref<32x1xf32, #tpu.memory_space<vmem>>, vector<32x1xf32>
    %39 = vector.broadcast %38 : vector<32x1xf32> to vector<32x128xf32>
    %40 = arith.addf %37, %39 : vector<32x128xf32>
    %c0_27 = arith.constant 0 : index
    %c0_28 = arith.constant 0 : index
    %41 = vector.load %arg10[%c0_27, %c0_28] : memref<32x32xbf16, #tpu.memory_space<vmem>>, vector<32x32xbf16>
    %cst_29 = arith.constant dense<0.000000e+00> : vector<32x128xf32>
    %42 = tpu.matmul %41, %35, %cst_29 {dimension_numbers = #tpu.dot_dimension_numbers<[1], [0], [0], [1], [0, 0, 1, 1], [], []>} : vector<32x32xbf16>, vector<32x128xbf16>, vector<32x128xf32> -> vector<32x128xf32>
    %c0_30 = arith.constant 0 : index
    %c0_31 = arith.constant 0 : index
    %43 = vector.load %arg13[%c0_30, %c0_31] : memref<32x1xf32, #tpu.memory_space<vmem>>, vector<32x1xf32>
    %44 = vector.broadcast %43 : vector<32x1xf32> to vector<32x128xf32>
    %45 = arith.addf %42, %44 : vector<32x128xf32>
    %c0_32 = arith.constant 0 : index
    %c0_33 = arith.constant 0 : index
    %46 = vector.load %arg11[%c0_32, %c0_33] : memref<32x32xbf16, #tpu.memory_space<vmem>>, vector<32x32xbf16>
    %cst_34 = arith.constant dense<0.000000e+00> : vector<32x128xf32>
    %47 = tpu.matmul %46, %35, %cst_34 {dimension_numbers = #tpu.dot_dimension_numbers<[1], [0], [0], [1], [0, 0, 1, 1], [], []>} : vector<32x32xbf16>, vector<32x128xbf16>, vector<32x128xf32> -> vector<32x128xf32>
    %c0_35 = arith.constant 0 : index
    %c0_36 = arith.constant 0 : index
    %48 = vector.load %arg14[%c0_35, %c0_36] : memref<32x1xf32, #tpu.memory_space<vmem>>, vector<32x1xf32>
    %49 = vector.broadcast %48 : vector<32x1xf32> to vector<32x128xf32>
    %50 = arith.addf %47, %49 : vector<32x128xf32>
    %cst_37 = arith.constant 5.000000e-01 : f32
    %51 = vector.broadcast %cst_37 : f32 to vector<32x128xf32>
    %52 = arith.mulf %51, %40 : vector<32x128xf32>
    %53 = math.tanh %52 : vector<32x128xf32>
    %cst_38 = arith.constant 5.000000e-01 : f32
    %54 = vector.broadcast %cst_38 : f32 to vector<32x128xf32>
    %55 = arith.mulf %54, %53 : vector<32x128xf32>
    %cst_39 = arith.constant 5.000000e-01 : f32
    %56 = vector.broadcast %cst_39 : f32 to vector<32x128xf32>
    %57 = arith.addf %55, %56 : vector<32x128xf32>
    %cst_40 = arith.constant 5.000000e-01 : f32
    %58 = vector.broadcast %cst_40 : f32 to vector<32x128xf32>
    %59 = arith.mulf %58, %45 : vector<32x128xf32>
    %60 = math.tanh %59 : vector<32x128xf32>
    %cst_41 = arith.constant 5.000000e-01 : f32
    %61 = vector.broadcast %cst_41 : f32 to vector<32x128xf32>
    %62 = arith.mulf %61, %60 : vector<32x128xf32>
    %cst_42 = arith.constant 5.000000e-01 : f32
    %63 = vector.broadcast %cst_42 : f32 to vector<32x128xf32>
    %64 = arith.addf %62, %63 : vector<32x128xf32>
    %65 = math.tanh %50 : vector<32x128xf32>
    %66 = arith.mulf %57, %65 : vector<32x128xf32>
    %67 = math.tanh %66 : vector<32x128xf32>
    %68 = arith.mulf %64, %67 : vector<32x128xf32>
    %69 = arith.truncf %68 : vector<32x128xf32> to vector<32x128xbf16>
    %c0_43 = arith.constant 0 : index
    %c0_44 = arith.constant 0 : index
    %c0_45 = arith.constant 0 : index
    %70 = vector.load %arg15[%c0_43, %c0_44, %c0_45] : memref<1x32x128xbf16, #tpu.memory_space<vmem>>, vector<1x32x128xbf16>
    %71 = vector.shape_cast %70 : vector<1x32x128xbf16> to vector<32x128xbf16>
    %72 = vector.shape_cast %69 : vector<32x128xbf16> to vector<1x32x128xbf16>
    tpu.vector_store %arg15[%c0_43, %c0_44, %c0_45], %72 {strides = array<i32>} : memref<1x32x128xbf16, #tpu.memory_space<vmem>>, vector<1x32x128xbf16>,
    return
  }
  func.func @transform_0(%arg0: i32, %arg1: i32) -> (i32, i32, i32) {
    %c0_i32 = arith.constant 0 : i32
    %c0_i32_0 = arith.constant 0 : i32
    return %arg0, %c0_i32, %arg1 : i32, i32, i32
  }
  func.func @transform_1(%arg0: i32, %arg1: i32) -> (i32, i32) {
    %c0_i32 = arith.constant 0 : i32
    %c0_i32_0 = arith.constant 0 : i32
    %c0_i32_1 = arith.constant 0 : i32
    return %c0_i32, %c0_i32_0 : i32, i32
  }
  func.func @transform_2(%arg0: i32, %arg1: i32) -> (i32, i32) {
    %c0_i32 = arith.constant 0 : i32
    %c0_i32_0 = arith.constant 0 : i32
    %c0_i32_1 = arith.constant 0 : i32
    return %c0_i32, %c0_i32_0 : i32, i32
  }
  func.func @transform_3(%arg0: i32, %arg1: i32) -> (i32, i32) {
    %c0_i32 = arith.constant 0 : i32
    %c0_i32_0 = arith.constant 0 : i32
    %c0_i32_1 = arith.constant 0 : i32
    return %c0_i32, %c0_i32_0 : i32, i32
  }
  func.func @transform_4(%arg0: i32, %arg1: i32) -> (i32, i32) {
    %c0_i32 = arith.constant 0 : i32
    %c0_i32_0 = arith.constant 0 : i32
    %c0_i32_1 = arith.constant 0 : i32
    return %c0_i32, %c0_i32_0 : i32, i32
  }
  func.func @transform_5(%arg0: i32, %arg1: i32) -> (i32, i32) {
    %c0_i32 = arith.constant 0 : i32
    %c0_i32_0 = arith.constant 0 : i32
    %c0_i32_1 = arith.constant 0 : i32
    return %c0_i32, %c0_i32_0 : i32, i32
  }
  func.func @transform_6(%arg0: i32, %arg1: i32) -> (i32, i32) {
    %c0_i32 = arith.constant 0 : i32
    %c0_i32_0 = arith.constant 0 : i32
    %c0_i32_1 = arith.constant 0 : i32
    return %c0_i32, %c0_i32_0 : i32, i32
  }
  func.func @transform_7(%arg0: i32, %arg1: i32) -> (i32, i32) {
    %c0_i32 = arith.constant 0 : i32
    %c0_i32_0 = arith.constant 0 : i32
    %c0_i32_1 = arith.constant 0 : i32
    return %c0_i32, %c0_i32_0 : i32, i32
  }
  func.func @transform_8(%arg0: i32, %arg1: i32) -> (i32, i32) {
    %c0_i32 = arith.constant 0 : i32
    %c0_i32_0 = arith.constant 0 : i32
    %c0_i32_1 = arith.constant 0 : i32
    return %c0_i32, %c0_i32_0 : i32, i32
  }
  func.func @transform_9(%arg0: i32, %arg1: i32) -> (i32, i32) {
    %c0_i32 = arith.constant 0 : i32
    %c0_i32_0 = arith.constant 0 : i32
    %c0_i32_1 = arith.constant 0 : i32
    return %c0_i32, %c0_i32_0 : i32, i32
  }
  func.func @transform_10(%arg0: i32, %arg1: i32) -> (i32, i32) {
    %c0_i32 = arith.constant 0 : i32
    %c0_i32_0 = arith.constant 0 : i32
    %c0_i32_1 = arith.constant 0 : i32
    return %c0_i32, %c0_i32_0 : i32, i32
  }
  func.func @transform_11(%arg0: i32, %arg1: i32) -> (i32, i32) {
    %c0_i32 = arith.constant 0 : i32
    %c0_i32_0 = arith.constant 0 : i32
    %c0_i32_1 = arith.constant 0 : i32
    return %c0_i32, %c0_i32_0 : i32, i32
  }
  func.func @transform_12(%arg0: i32, %arg1: i32) -> (i32, i32) {
    %c0_i32 = arith.constant 0 : i32
    %c0_i32_0 = arith.constant 0 : i32
    %c0_i32_1 = arith.constant 0 : i32
    return %c0_i32, %c0_i32_0 : i32, i32
  }
  func.func @transform_13(%arg0: i32, %arg1: i32) -> (i32, i32, i32) {
    %c0_i32 = arith.constant 0 : i32
    %c0_i32_0 = arith.constant 0 : i32
    return %arg0, %c0_i32, %arg1 : i32, i32, i32
  }
}

</mosaic_0001>

<bundles_post_ra>
// kernel: convlstm_forward.1
= control target key start
LH: loop header
LB: loop body
LE: loop exit
PB: predicated region body
PF: predicated region fallthrough
CT: control target
= control target key end

     0   :  { %s1435_s25 = smov 0   ;;  %s1437_s26 = smov 0   ;;  %s1644_s0 = inlined_call_operand.vmem [shape: bf16[2,4,256], index: 0, kind: input, shape index: {}]   ;;  %s1645_s1 = inlined_call_operand.vmem [shape: bf16[32,4], index: 1, kind: input, shape index: {}]   ;;  %s1646_s2 = inlined_call_operand.vmem [shape: bf16[32,4], index: 2, kind: input, shape index: {}]   ;;  %s1647_s3 = inlined_call_operand.vmem [shape: bf16[32,4], index: 3, kind: input, shape index: {}]   ;;  %s1648_s4 = inlined_call_operand.vmem [shape: f32[32,1], index: 4, kind: input, shape index: {}]   ;;  %s1649_s5 = inlined_call_operand.vmem [shape: f32[32,1], index: 5, kind: input, shape index: {}]   ;;  %s1650_s6 = inlined_call_operand.vmem [shape: f32[32,1], index: 6, kind: input, shape index: {}]   ;;  %s1651_s7 = inlined_call_operand.vmem [shape: bf16[32,32], index: 7, kind: input, shape index: {}]   ;;  %s1652_s8 = inlined_call_operand.vmem [shape: bf16[32,32], index: 8, kind: input, shape index: {}]   ;;  %s1653_s9 = inlined_call_operand.vmem [shape: bf16[32,32], index: 9, kind: input, shape index: {}]   ;;  %s1654_s10 = inlined_call_operand.vmem [shape: f32[32,1], index: 10, kind: input, shape index: {}]   ;;  %s1655_s11 = inlined_call_operand.vmem [shape: f32[32,1], index: 11, kind: input, shape index: {}]   ;;  %s1656_s12 = inlined_call_operand.vmem [shape: f32[32,1], index: 12, kind: input, shape index: {}]   ;;  %s1657_s13 = inlined_call_operand.vmem [shape: bf16[2,32,256], index: 13, kind: output, shape index: {}]  }
   0x1   :  { %s1439_s27 = smov 0   ;;  %s1441_s28 = smov 0  }
   0x2   :  { %s1443_s29 = smov 0   ;;  %s1445_s30 = smov 0  }
   0x3   :  { %s1447_s14 = smov 0  }
   0x4 LB: > { %1664 = sst [smem:[#allocation3_spill]] %s1342_s26  ;;  %s32_s15 = sadd.s32 1, %s1354_s29  ;;  %s1362_s14 = sphi %s1447_s14, %s23_s14   ;;  %s1358_s30 = sphi %s1445_s30, %s1678_s30   ;;  %s1354_s29 = sphi %s1443_s29, %s1677_s29   ;;  %s1350_s28 = sphi %s1441_s28, %s1676_s28   ;;  %s1346_s27 = sphi %s1439_s27, %s1675_s27   ;;  %s1342_s26 = sphi %s1437_s26, %s1674_s26   ;;  %s1338_s25 = sphi %s1435_s25, %s1673_s25  }
   0x5   : > { %1665 = sst [smem:[#allocation4_spill]] %s1354_s29  ;;  %p33_p0 = scmp.ge.s32.totalorder %s32_s15, 2 }
   0x6   : > { %1666 = sst [smem:[#allocation5_spill]] %s1358_s30  ;;  %s35_s16 = sadd.s32 1, %s1358_s30 }
   0x7   : > { %1667 = sst [smem:[#allocation6_spill]] %s1362_s14  ;;  %s1086_s17 = sadd.s32 4294967295, %s1362_s14  }
   0x8   : > { %p334_p1 = scmp.ne.s32.totalorder %s1342_s26, %s1338_s25  ;;  %s1680_s15 = smov (%p33_p0, %s32_s15), 0 }
   0x9   : > { %1668 = sst [smem:[#allocation7_spill]] %s1680_s15  ;;  %s1682_s16 = smov (!%p33_p0, %s35_s16), %s1358_s30 }
   0xa   : > { %s320_s18 = ssub.s32 %s1354_s29, %s1680_s15  ;;  %p335_p2 = scmp.eq.s32.totalorder %s1086_s17, 3 }
   0xb   : > { %p37_p3 = scmp.ge.s32.totalorder %s1682_s16, 2  ;;  %p1090_p4 = scmp.ge.s32.totalorder %s1362_s14, 1 }
   0xc   : > { %p1481_p5 = por %p335_p2, %p334_p1  ;;  %p406_p6 = scmp.lt.s32.totalorder %s1362_s14, 5 }
   0xd   : > { %s1684_s16 = smov (%p37_p3, %s1682_s16), 0  ;;  %s324_s22 = sadd.s32 1, %s1342_s26 }
   0xe   : > { %1670 = sst [smem:[#allocation8_spill]] %s1684_s16  ;;  %p407_p7 = pnand %p1090_p4, %p406_p6 }
   0xf   : > { %s319_s20 = ssub.s32 %s1358_s30, %s1684_s16  ;;  %p452_p9 = scmp.lt.s32.totalorder (!%p407_p7), %s1350_s28, 1 }
  0x10   : > { %s321_s21 = sor.u32 %s320_s18, %s319_s20  ;;  %p454_p10 = scmp.lt.s32.totalorder (!%p407_p7), %s1346_s27, 1 }
  0x11   : > { %p322_p8 = scmp.eq.s32.totalorder %s321_s21, 0  ;;  %410 = sbr.rel (%p407_p7) target bundleno = 428 (0x1ac), region = 72 }
  0x13   : > { %s1492_s23 = scalar_select %p322_p8, %s1342_s26, %s324_s22  }
  0x15   : > { %1671 = sst [smem:[#allocation9_spill]] %s1492_s23  ;;  %s449_s23 = sand.u32 (!%p407_p7), 1, %s1338_s25  }
  0x16   : > { %v468_v0 = vld [vmem:[%s1648_s4 + $0x10] sm:$0xff]  ;;  %v466_v1 = vld [vmem:[%s1648_s4] sm:$0xff]  ;;  %v1364_v2 = vmov 0   ;;  %s453_s18 = scalar_select %p452_p9, %s1350_s28, 1  ;;  %vm507_vm0 = vcmask 1041408   ;;  %v469_v4 = vld [vmem:[%s1648_s4 + $0x18] sm:$0xff] }
  0x17   : > { %1242 = vset.pattern.permute.xlu1 %v1364_v2  ;;  %1241 = vset.pattern.permute.xlu0 %v1364_v2  ;;  %v599_v3 = vld [vmem:[%s1650_s6 + $0x10] sm:$0xff]  ;;  %s455_s22 = scalar_select %p454_p10, %s1346_s27, 1  ;;  %v467_v5 = vld [vmem:[%s1648_s4 + $0x8] sm:$0xff]  ;;  %v1159_v9 = vld [vmem:[%s1645_s1] sm:$0xff]  ;;  %vm500_vm1 = vcmask 31744   ;;  %vm744_vm2 = vcmask 261120  }
  0x18   : > { %482 = vperm.xlu0 %1241, %v468_v0   ;;  %472 = vperm.xlu1 %1242, %v466_v1   ;;  %s1092_s24 = sshll.u32 %s453_s18, 1  ;;  %v1160_v8 = vld [vmem:[%s1645_s1 + $0x8] sm:$0xff]  ;;  %v600_v10 = vld [vmem:[%s1650_s6 + $0x18] sm:$0xff]  ;;  %v1161_v12 = vld [vmem:[%s1646_s2] sm:$0xff]  ;;  %s1091_s15 = sshll.u32 %s449_s23, 4 }
  0x19   : > { %1243 = vset.pattern.permute.xlu2 %v1364_v2  ;;  %s457_s17 = sadd.s32 %s1092_s24, %s455_s22  ;;  %v1162_v11 = vld [vmem:[%s1646_s2 + $0x8] sm:$0xff]  ;;  %v536_v13 = vld [vmem:[%s1649_s5 + $0x10] sm:$0xff]  ;;  %v537_v14 = vld [vmem:[%s1649_s5 + $0x18] sm:$0xff]  ;;  %s451_s25 = scalar_lea.vmem [#allocation2], %s1091_s15 }
  0x1a   : > { %613 = vperm.xlu2 %1243, %v599_v3   ;;  %s1093_s16 = sshll.u32 %s457_s17, 1  ;;  %v597_v15 = vld [vmem:[%s1650_s6] sm:$0xff]  ;;  %v598_v16 = vld [vmem:[%s1650_s6 + $0x8] sm:$0xff]  ;;  %v712_v22 = vld [vmem:[%s1654_s10 + $0x10] sm:$0xff] }
  0x1b   : > { %s459_s20 = scalar_lea.vmem %s1644_s0, %s1093_s16  ;;  %v534_v17 = vld [vmem:[%s1649_s5] sm:$0xff]  ;;  %v535_v19 = vld [vmem:[%s1649_s5 + $0x8] sm:$0xff]  ;;  %v713_v23 = vld [vmem:[%s1654_s10 + $0x18] sm:$0xff] }
  0x1c   : > { %v461_v6 = vld [vmem:[%s459_s20] sm:$0x3]  ;;  %v711_v21 = vld [vmem:[%s1654_s10 + $0x8] sm:$0xff]  ;;  %v839_v27 = vld [vmem:[%s1656_s12 + $0x10] sm:$0xff]  ;;  %s1155_s20 = sshll.u32 (%p1481_p5), %s1350_s28, 3 }
  0x1d   : > { %v509_v7 = vsel %vm507_vm0, %v461_v6, 0  ;;  %v1163_v18 = vld [vmem:[%s1647_s3] sm:$0xff]  ;;  %v1164_v25 = vld [vmem:[%s1647_s3 + $0x8] sm:$0xff]  ;;  %v840_v28 = vld [vmem:[%s1656_s12 + $0x18] sm:$0xff]  ;;  %s960_s18 = sadd.s32 (%p1481_p5), %s1346_s27, %s1155_s20 }
  0x1e   : > { %1182 = vmatpush.bf16.msra.mxu2 %v509_v7  ;;  %518 = vmatpush.bf16.msra.mxu0 %v509_v7  ;;  %v710_v20 = vld [vmem:[%s1654_s10] sm:$0xff]  ;;  %v838_v26 = vld [vmem:[%s1656_s12 + $0x8] sm:$0xff]  ;;  %v776_v31 = vld [vmem:[%s1655_s11 + $0x10] sm:$0xff]  ;;  %s1156_s21 = sshll.u32 (%p1481_p5), %s960_s18, 2 }
  0x1f   : > { %1183 = vmatpush.bf16.msra.mxu3 %v509_v7  ;;  %581 = vmatpush.bf16.msra.mxu1 %v509_v7  ;;  %v837_v24 = vld [vmem:[%s1656_s12] sm:$0xff]  ;;  %v775_v30 = vld [vmem:[%s1655_s11 + $0x8] sm:$0xff]  ;;  %v777_v32 = vld [vmem:[%s1655_s11 + $0x18] sm:$0xff]  ;;  %s962_s17 = scalar_lea.vmem (%p1481_p5), %s1657_s13, %s1156_s21 }
  0x20   : > { %487 = vperm.xlu0 %1241, %v469_v4   ;;  %477 = vperm.xlu1 %1242, %v467_v5   ;;  %v774_v29 = vld [vmem:[%s1655_s11] sm:$0xff] }
  0x21   : > { %1103 = vmatmul.msk.bf16.vlgmr.msra.gmra.mxu2 %vm500_vm1, %v1160_v8  ;;  %1102 = vmatmul.msk.bf16.vlgmr.msra.gmra.mxu0 %vm500_vm1, %v1159_v9 }
  0x22   : > { %644 = vmatpush.bf16.msrb.mxu2 %v509_v7  ;;  %618 = vperm.xlu2 %1243, %v600_v10  }
  0x23   : > { %1113 = vmatmul.msk.bf16.vlgmr.msra.gmra.mxu3 %vm500_vm1, %v1162_v11  ;;  %1112 = vmatmul.msk.bf16.vlgmr.msra.gmra.mxu1 %vm500_vm1, %v1161_v12 }
  0x28   : > { %550 = vperm.xlu0 %1241, %v536_v13   ;;  %555 = vperm.xlu1 %1242, %v537_v14  }
  0x2a   : > { %603 = vperm.xlu2 %1243, %v597_v15  }
  0x30   : > { %608 = vperm.xlu0 %1241, %v598_v16   ;;  %540 = vperm.xlu1 %1242, %v534_v17  }
  0x31   : > { %1122 = vmatmul.msk.bf16.vlgmr.msrb.gmra.mxu2 %vm500_vm1, %v1163_v18 }
  0x32   : > { %545 = vperm.xlu2 %1243, %v535_v19  }
  0x38   : > { %716 = vperm.xlu0 %1241, %v710_v20   ;;  %721 = vperm.xlu1 %1242, %v711_v21  }
  0x3a   : > { %726 = vperm.xlu2 %1243, %v712_v22  }
  0x40   : > { %731 = vperm.xlu0 %1241, %v713_v23   ;;  %843 = vperm.xlu1 %1242, %v837_v24  }
  0x41   : > { %1123 = vmatmul.msk.bf16.gmra.mxu2 %vm500_vm1, %v1164_v25 }
  0x42   : > { %848 = vperm.xlu2 %1243, %v838_v26  }
  0x48   : > { %853 = vperm.xlu0 %1241, %v839_v27   ;;  %858 = vperm.xlu1 %1242, %v840_v28  }
  0x4a   : > { %780 = vperm.xlu2 %1243, %v774_v29  }
  0x50   : > { %785 = vperm.xlu0 %1241, %v775_v30   ;;  %790 = vperm.xlu1 %1242, %v776_v31  }
  0x52   : > { %795 = vperm.xlu2 %1243, %v777_v32  }
  0x74   : > { %v614_v36 = vpop.permute.xlu2 %613 }
  0x7c   : > { %v619_v42 = vpop.permute.xlu2 %618 }
  0x84   : > { %v604_v53 = vpop.permute.xlu2 %603 }
  0x8a   : > { %v483_v34 = vpop.permute.xlu0 %482  ;;  %v473_v35 = vpop.permute.xlu1 %472 }
  0x8c   : > { %v546_v5 = vpop.permute.xlu2 %545 }
  0x92   : > { %v488_v39 = vpop.permute.xlu0 %487  ;;  %v478_v40 = vpop.permute.xlu1 %477 }
  0x9a   : > { %v551_v45 = vpop.permute.xlu0 %550  ;;  %v556_v51 = vpop.permute.xlu1 %555 }
  0x9e   : > { %v520_v38 = vpop.f32.mrf.mxu0 }
  0x9f   : > { %v521_v49 = vadd.f32 %v520_v38, %v473_v35 }
  0xa0   : > { %v583_v50 = vpop.f32.mrf.mxu1 }
  0xa1   : > { %v656_v56 = vmul.f32 0.5, %v521_v49 }
  0xa2   : > { %v609_v59 = vpop.permute.xlu0 %608  ;;  %v541_v2 = vpop.permute.xlu1 %540 }
  0xa3   : > { %v584_v7 = vadd.f32 %v583_v50, %v541_v2 }
  0xa4   : > { %v525_v33 = vpop.f32.mrf.mxu2 }
  0xa5   : > { %v526_v46 = vadd.f32 %v525_v33, %v483_v34  ;;  %v672_v16 = vmul.f32 0.5, %v584_v7 }
  0xa6   : > { %v522_v43 = vpop.f32.mrf.mxu0  ;;  %v588_v47 = vpop.f32.mrf.mxu3 }
  0xa7   : > { %v523_v44 = vadd.f32 %v522_v43, %v478_v40  ;;  %v658_v54 = vmul.f32 0.5, %v526_v46  ;;  %v589_v62 = vadd.f32 %v588_v47, %v551_v45 }
  0xa8   : > { %v585_v0 = vpop.f32.mrf.mxu1 }
  0xa9   : > { %v657_v52 = vmul.f32 0.5, %v523_v44  ;;  %v674_v8 = vmul.f32 0.5, %v589_v62  ;;  %v586_v9 = vadd.f32 %v585_v0, %v546_v5  ;;  %v727_v62 = vpop.permute.xlu2 %726 }
  0xaa   : > { %v722_v0 = vpop.permute.xlu1 %721 }
  0xab   : > { %1244 = vtanh.f32 %v657_v52  ;;  %v673_v19 = vmul.f32 0.5, %v586_v9 }
  0xac   : > { %v527_v37 = vpop.f32.mrf.mxu2  ;;  %1246 = vtanh.f32 %v658_v54 }
  0xad   : > { %v528_v55 = vadd.f32 %v527_v37, %v488_v39  ;;  %1248 = vtanh.f32 %v656_v56  ;;  %v1167_v56 = vld [vmem:[%s1652_s8] sm:$0xff] }
  0xae   : > { %v590_v60 = vpop.f32.mrf.mxu3 }
  0xaf   : > { %v659_v57 = vmul.f32 0.5, %v528_v55  ;;  %v591_v3 = vadd.f32 %v590_v60, %v556_v51  ;;  %v1165_v55 = vld [vmem:[%s1651_s7] sm:$0xff]  ;;  %v1170_v60 = vld [vmem:[%s1653_s9 + $0x8] sm:$0xff] }
  0xb1   : > { %1250 = vtanh.f32 %v659_v57  ;;  %v1245_v1 = vpop.eup %1244  ;;  %v675_v13 = vmul.f32 0.5, %v591_v3  ;;  %v1169_v57 = vld [vmem:[%s1653_s9] sm:$0xff]  ;;  %v849_v3 = vpop.permute.xlu2 %848 }
  0xb2   : > { %v1247_v4 = vpop.eup %1246  ;;  %v665_v11 = vmul.f32 0.5, %v1245_v1  ;;  %v844_v7 = vpop.permute.xlu1 %843 }
  0xb3   : > { %v1249_v10 = vpop.eup %1248  ;;  %v666_v12 = vmul.f32 0.5, %v1247_v4 }
  0xb4   : > { %v646_v41 = vpop.f32.mrf.mxu2  ;;  %v664_v18 = vmul.f32 0.5, %v1249_v10  ;;  %v669_v21 = vadd.f32 0.5, %v665_v11 }
  0xb5   : > { %v647_v6 = vadd.f32 %v646_v41, %v604_v53  ;;  %v670_v23 = vadd.f32 0.5, %v666_v12 }
  0xb6   : > { %v668_v25 = vadd.f32 0.5, %v664_v18 }
  0xb7   : > { %v1251_v15 = vpop.eup %1250 }
  0xb8   : > { %v667_v24 = vmul.f32 0.5, %v1251_v15 }
  0xb9   : > { %v781_v11 = vpop.permute.xlu2 %780 }
  0xba   : > { %v671_v30 = vadd.f32 0.5, %v667_v24 }
  0xbc   : > { %v648_v48 = vpop.f32.mrf.mxu2 }
  0xbd   : > { %v649_v63 = vadd.f32 %v648_v48, %v609_v59  ;;  %v1168_v59 = vld [vmem:[%s1652_s8 + $0x8] sm:$0xff] }
  0xc4   : > { %v651_v58 = vpop.f32.mrf.mxu2 }
  0xc5   : > { %v652_v61 = vadd.f32 %v651_v58, %v614_v36  ;;  %v1166_v58 = vld [vmem:[%s1651_s7 + $0x8] sm:$0xff] }
  0xc7   : > { %1252 = vtanh.f32 %v652_v61  ;;  %v717_v61 = vpop.permute.xlu0 %716 }
  0xc8   : > { %1254 = vtanh.f32 %v649_v63 }
  0xc9   : > { %1256 = vtanh.f32 %v647_v6 }
  0xca   : > { %1258 = vtanh.f32 %v674_v8 }
  0xcc   : > { %v653_v14 = vpop.f32.mrf.mxu2 }
  0xcd   : > { %v654_v17 = vadd.f32 %v653_v14, %v619_v42  ;;  %v1253_v20 = vpop.eup %1252 }
  0xce   : > { %v1255_v22 = vpop.eup %1254  ;;  %v694_v26 = vmul.f32 %v1253_v20, %v670_v23 }
  0xcf   : > { %1260 = vtanh.f32 %v654_v17  ;;  %v1257_v27 = vpop.eup %1256  ;;  %v693_v28 = vmul.f32 %v1255_v22, %v669_v21  ;;  %v732_v63 = vpop.permute.xlu0 %731 }
  0xd0   : > { %1262 = vtanh.f32 %v675_v13  ;;  %v1259_v29 = vpop.eup %1258  ;;  %v692_v33 = vmul.f32 %v1257_v27, %v668_v25  ;;  %v859_v22 = vpop.permute.xlu1 %858 }
  0xd1   : > { %1264 = vtanh.f32 %v672_v16  ;;  %v682_v37 = vmul.f32 0.5, %v1259_v29 }
  0xd2   : > { %1266 = vtanh.f32 %v673_v19 }
  0xd3   : > { %1268 = vtanh.f32 %v694_v26  ;;  %v686_v43 = vadd.f32 0.5, %v682_v37 }
  0xd4   : > { %1270 = vtanh.f32 %v693_v28 }
  0xd5   : > { %v1261_v31 = vpop.eup %1260 }
  0xd6   : > { %v1263_v32 = vpop.eup %1262  ;;  %v695_v34 = vmul.f32 %v1261_v31, %v671_v30 }
  0xd7   : > { %v1265_v35 = vpop.eup %1264  ;;  %v683_v38 = vmul.f32 0.5, %v1263_v32  ;;  %v854_v4 = vpop.permute.xlu0 %853 }
  0xd8   : > { %v1267_v36 = vpop.eup %1266  ;;  %1272 = vtanh.f32 %v695_v34  ;;  %v680_v39 = vmul.f32 0.5, %v1265_v35 }
  0xd9   : > { %1274 = vtanh.f32 %v692_v33  ;;  %v681_v40 = vmul.f32 0.5, %v1267_v36  ;;  %v1269_v41 = vpop.eup %1268  ;;  %v687_v44 = vadd.f32 0.5, %v683_v38  ;;  %v791_v38 = vpop.permute.xlu1 %790 }
  0xda   : > { %v1271_v42 = vpop.eup %1270  ;;  %v684_v46 = vadd.f32 0.5, %v680_v39  ;;  %v702_v48 = vmul.f32 %v1269_v41, %v686_v43 }
  0xdb   : > { %v685_v47 = vadd.f32 0.5, %v681_v40 }
  0xdd   : > { %v701_v51 = vmul.f32 %v1271_v42, %v685_v47 }
  0xde   : > { %v1273_v45 = vpop.eup %1272 }
  0xdf   : > { %v703_v49 = vmul.f32 %v1273_v45, %v687_v44  ;;  %v1275_v50 = vpop.eup %1274  ;;  %v786_v15 = vpop.permute.xlu0 %785 }
  0xe0   : > { %v700_v53 = vmul.f32 %v1275_v50, %v684_v46  ;;  %v796_v45 = vpop.permute.xlu2 %795 }
  0xe1   : > { %v705_v52 = vpack.c.bf16 %v703_v49, %v702_v48 }
  0xe2   : > { %v704_v54 = vpack.c.bf16 %v701_v51, %v700_v53 }
  0xe3   : > { %757 = vmatpush.bf16.msrb.mxu3 %v705_v52  ;;  %820 = vmatpush.bf16.msrb.mxu0 %v705_v52 }
  0xe4   : > { %883 = vmatpush.bf16.msrb.mxu1 %v705_v52 }
  0xe7   : > { %758 = vmatpush.bf16.msrb.mxu3 %v704_v54  ;;  %821 = vmatpush.bf16.msrb.mxu0 %v704_v54 }
  0xe8   : > { %884 = vmatpush.bf16.msrb.mxu1 %v704_v54 }
  0xea   : > { %1132 = vmatmul.msk.bf16.vlgmr.msrb.gmra.mxu3 %vm744_vm2, %v1165_v55  ;;  %1142 = vmatmul.msk.bf16.vlgmr.msrb.gmra.mxu0 %vm744_vm2, %v1167_v56 }
  0xeb   : > { %1152 = vmatmul.msk.bf16.vlgmr.msrb.gmra.mxu1 %vm744_vm2, %v1169_v57 }
  0xfa   : > { %1133 = vmatmul.msk.bf16.gmra.mxu3 %vm744_vm2, %v1166_v58  ;;  %1143 = vmatmul.msk.bf16.gmra.mxu0 %vm744_vm2, %v1168_v59 }
  0xfb   : > { %1153 = vmatmul.msk.bf16.gmra.mxu1 %vm744_vm2, %v1170_v60 }
 0x167   : > { %v823_v1 = vpop.f32.mrf.mxu0 }
 0x168   : > { %v886_v2 = vpop.f32.mrf.mxu1  ;;  %v824_v12 = vadd.f32 %v823_v1, %v781_v11 }
 0x169   : > { %v887_v13 = vadd.f32 %v886_v2, %v844_v7 }
 0x16a   : > { %v912_v20 = vmul.f32 0.5, %v824_v12 }
 0x16d   : > { %v760_v5 = vpop.f32.mrf.mxu3 }
 0x16e   : > { %v761_v6 = vadd.f32 %v760_v5, %v717_v61 }
 0x16f   : > { %v825_v9 = vpop.f32.mrf.mxu0 }
 0x170   : > { %v896_v8 = vmul.f32 0.5, %v761_v6  ;;  %v888_v10 = vpop.f32.mrf.mxu1  ;;  %v826_v17 = vadd.f32 %v825_v9, %v786_v15 }
 0x171   : > { %v889_v23 = vadd.f32 %v888_v10, %v849_v3 }
 0x172   : > { %1276 = vtanh.f32 %v896_v8  ;;  %v913_v25 = vmul.f32 0.5, %v826_v17 }
 0x173   : > { %1278 = vtanh.f32 %v887_v13 }
 0x175   : > { %v762_v14 = vpop.f32.mrf.mxu3 }
 0x176   : > { %v763_v16 = vadd.f32 %v762_v14, %v722_v0 }
 0x177   : > { %v828_v24 = vpop.f32.mrf.mxu0 }
 0x178   : > { %v1277_v18 = vpop.eup %1276  ;;  %v897_v19 = vmul.f32 0.5, %v763_v16  ;;  %v891_v27 = vpop.f32.mrf.mxu1  ;;  %v829_v42 = vadd.f32 %v828_v24, %v791_v38 }
 0x179   : > { %v904_v21 = vmul.f32 0.5, %v1277_v18  ;;  %v1279_v30 = vpop.eup %1278  ;;  %v892_v43 = vadd.f32 %v891_v27, %v854_v4 }
 0x17a   : > { %1280 = vtanh.f32 %v897_v19  ;;  %v914_v53 = vmul.f32 0.5, %v829_v42 }
 0x17b   : > { %1282 = vtanh.f32 %v912_v20  ;;  %v908_v26 = vadd.f32 0.5, %v904_v21 }
 0x17c   : > { %1284 = vtanh.f32 %v889_v23 }
 0x17d   : > { %v765_v28 = vpop.f32.mrf.mxu3  ;;  %1286 = vtanh.f32 %v913_v25  ;;  %v932_v33 = vmul.f32 %v1279_v30, %v908_v26 }
 0x17e   : > { %v766_v29 = vadd.f32 %v765_v28, %v727_v62 }
 0x17f   : > { %v830_v39 = vpop.f32.mrf.mxu0 }
 0x180   : > { %v1281_v31 = vpop.eup %1280  ;;  %v898_v32 = vmul.f32 0.5, %v766_v29  ;;  %v831_v47 = vadd.f32 %v830_v39, %v796_v45  ;;  %v893_v48 = vpop.f32.mrf.mxu1 }
 0x181   : > { %v905_v34 = vmul.f32 0.5, %v1281_v31  ;;  %v1283_v35 = vpop.eup %1282  ;;  %v894_v55 = vadd.f32 %v893_v48, %v859_v22 }
 0x182   : > { %1288 = vtanh.f32 %v898_v32  ;;  %v1285_v37 = vpop.eup %1284  ;;  %v920_v50 = vmul.f32 0.5, %v1283_v35  ;;  %v915_v57 = vmul.f32 0.5, %v831_v47 }
 0x183   : > { %v909_v36 = vadd.f32 0.5, %v905_v34  ;;  %v1287_v40 = vpop.eup %1286  ;;  %1290 = vtanh.f32 %v932_v33 }
 0x184   : > { %v921_v51 = vmul.f32 0.5, %v1287_v40  ;;  %v924_v58 = vadd.f32 0.5, %v920_v50 }
 0x185   : > { %v933_v41 = vmul.f32 %v1285_v37, %v909_v36  ;;  %v767_v44 = vpop.f32.mrf.mxu3 }
 0x186   : > { %v768_v46 = vadd.f32 %v767_v44, %v732_v63  ;;  %v925_v59 = vadd.f32 0.5, %v921_v51 }
 0x187   : > { %1292 = vtanh.f32 %v933_v41 }
 0x188   : > { %v1289_v49 = vpop.eup %1288  ;;  %v899_v52 = vmul.f32 0.5, %v768_v46  ;;  %1294 = vtanh.f32 %v892_v43 }
 0x189   : > { %v906_v54 = vmul.f32 0.5, %v1289_v49  ;;  %v1291_v56 = vpop.eup %1290 }
 0x18a   : > { %1296 = vtanh.f32 %v899_v52  ;;  %v940_v62 = vmul.f32 %v1291_v56, %v924_v58 }
 0x18b   : > { %1298 = vtanh.f32 %v914_v53  ;;  %v910_v61 = vadd.f32 0.5, %v906_v54 }
 0x18c   : > { %1300 = vtanh.f32 %v894_v55 }
 0x18d   : > { %v1293_v60 = vpop.eup %1292  ;;  %1302 = vtanh.f32 %v915_v57 }
 0x18e   : > { %v941_v63 = vmul.f32 %v1293_v60, %v925_v59  ;;  %v1295_v0 = vpop.eup %1294 }
 0x18f   : > { %v934_v3 = vmul.f32 %v1295_v0, %v910_v61 }
 0x190   : > { %v1297_v1 = vpop.eup %1296  ;;  %v1174_v2 = vpack.c.bf16 %v941_v63, %v940_v62 }
 0x191   : > { %v907_v4 = vmul.f32 0.5, %v1297_v1  ;;  %v1299_v5 = vpop.eup %1298  ;;  %1304 = vtanh.f32 %v934_v3 }
 0x192   : > { %1175 = vst [vmem:[%s451_s25] sm:$0xff] %v1174_v2   ;;  %v1301_v7 = vpop.eup %1300  ;;  %v922_v10 = vmul.f32 0.5, %v1299_v5 }
 0x193   : > { %v911_v6 = vadd.f32 0.5, %v907_v4  ;;  %v1303_v8 = vpop.eup %1302 }
 0x194   : > { %v923_v11 = vmul.f32 0.5, %v1303_v8  ;;  %v926_v13 = vadd.f32 0.5, %v922_v10 }
 0x195   : > { %v935_v9 = vmul.f32 %v1301_v7, %v911_v6 }
 0x196   : > { %v927_v14 = vadd.f32 0.5, %v923_v11 }
 0x197   : > { %1306 = vtanh.f32 %v935_v9  ;;  %v1305_v12 = vpop.eup %1304 }
 0x198   : > { %v942_v16 = vmul.f32 %v1305_v12, %v926_v13 }
 0x199   : > { %v979_v19 = vld [vmem:[%s451_s25] sm:$0xf] (%p1481_p5)  ;;  %v981_v20 = vld [vmem:[%s451_s25 + $0x4] sm:$0xf] (%p1481_p5) }
 0x19a   : > { %980 = vst [vmem:[%s962_s17] sm:$0xf] (%p1481_p5), %v979_v19 }
 0x19b   : > { %982 = vst [vmem:[%s962_s17 + $0x8] sm:$0xf] (%p1481_p5), %v981_v20 }
 0x19d   : > { %v1307_v15 = vpop.eup %1306 }
 0x19e   : > { %v943_v17 = vmul.f32 %v1307_v15, %v927_v14  ;;  %958 = sbr.rel (!%p1481_p5) target bundleno = 428 (0x1ac), region = 76 }
 0x1a0   : > { %v1179_v18 = vpack.c.bf16 %v943_v17, %v942_v16 }
 0x1a2   : > { %1181 = vst [vmem:[%s451_s25 + $0x8] sm:$0xff] %v1179_v18  }
 0x1a9   : > { %v983_v21 = vld [vmem:[%s451_s25 + $0x8] sm:$0xf]  ;;  %v985_v22 = vld [vmem:[%s451_s25 + $0xc] sm:$0xf] }
 0x1aa   : > { %984 = vst [vmem:[%s962_s17 + $0x10] sm:$0xf] %v983_v21 }
 0x1ab   : > { %986 = vst [vmem:[%s962_s17 + $0x18] sm:$0xf] %v985_v22 }
 0x1ac PF: > { %s1672_s19 = sld [smem:[#allocation6_spill]] }
 0x1ad   : > { %s1673_s25 = sld [smem:[#allocation3_spill]] }
 0x1ae   : > { %s1674_s26 = sld [smem:[#allocation9_spill]] }
 0x1af   : > { %s1675_s27 = sld [smem:[#allocation4_spill]] }
 0x1b0   : > { %s1676_s28 = sld [smem:[#allocation5_spill]] }
 0x1b1   : > { %s1677_s29 = sld [smem:[#allocation7_spill]] }
 0x1b2   : > { %s23_s14 = sadd.s32 1, %s1672_s19   ;;  %s1678_s30 = sld [smem:[#allocation8_spill]] }
 0x1b3   : > { %p20_p11 = scmp.ge.s32.totalorder %s23_s14, 6  }
 0x1b5   :  { %22 = sbr.rel (!%p20_p11) target bundleno = 4 (0x4), region = 143 }

</bundles_post_ra>
